<compile_context>
chip_gen: v7x
topology: tpu7x:2x2x1
jax: 0.10.0
libtpu: 0.0.40
codegen_flags: <defaults>
</compile_context>

<pallas_src>
import functools

import jax
import jax.numpy as jnp
from jax.experimental import pallas as pl
from jax.experimental.pallas import tpu as pltpu


def _round_up(x, m):
    return ((x + m - 1) // m) * m


def _conv2d_kernel(ph_ref, w_ref, b_ref, o_ref, *, kh, kw, stride):
    """Tap-unrolled cross-correlation on pre-split stride phases.

    ph_ref : (stride*stride, PH, PW) f32 in VMEM; phase (p, q) == x[p::s, q::s]
    w_ref  : (kh, kw) f32 in SMEM (scalar taps)
    b_ref  : (1,)     f32 in SMEM (scalar bias)
    o_ref  : (OH_pad, OW_pad) f32 in VMEM (lane-dense; wrapper slices to (OH, OW))
    """
    oh, ow = o_ref.shape
    # Initialize the accumulator with the scalar bias (SMEM scalar broadcast).
    acc = jnp.full((oh, ow), b_ref[0], dtype=jnp.float32)
    # Static unroll over kernel taps. Each tap reads a contiguous offset window
    # of the stride phase selected by (di % s, dj % s) and does one FMA on the
    # VPU with a scalar weight from SMEM. No per-tap strided gathers.
    for di in range(kh):
        for dj in range(kw):
            p = (di % stride) * stride + (dj % stride)
            r0 = di // stride
            c0 = dj // stride
            win = ph_ref[p, r0:r0 + oh, c0:c0 + ow]
            acc = acc + win * w_ref[di, dj]
    o_ref[...] = acc


def conv2d(x, weight, bias, stride):
    """Pallas equivalent of Conv2D.forward: corr2d(x, weight, stride) + bias."""
    H, W = x.shape
    KH, KW = weight.shape
    s = int(stride)
    OH = (H - KH) // s + 1   # floor division, same as the PyTorch reference
    OW = (W - KW) // s + 1

    x = x.astype(jnp.float32)
    weight = weight.astype(jnp.float32)
    bias = jnp.asarray(bias, jnp.float32).reshape((1,))

    # Lane-dense output tile: second-to-last dim multiple of 8, last dim
    # multiple of 128 -> unmasked stores; wrapper slices the valid region.
    OH_pad = max(_round_up(OH, 8), 8)
    OW_pad = max(_round_up(OW, 128), 128)

    # Phase extents: tap (di, dj) reads phase[(di%s, dj%s)][di//s : di//s+OH_pad,
    # dj//s : dj//s+OW_pad], so pad to cover the largest tap offset.
    PH = _round_up(OH_pad + (KH - 1) // s, 8)
    PW = _round_up(OW_pad + (KW - 1) // s, 128)
    Hp, Wp = s * PH, s * PW

    # One-time stride reshuffle (wrapper-side layout plumbing): zero-pad, then
    # split x into its s*s stride phases. Zero padding is never read inside the
    # valid (OH, OW) region, and the padded output region is sliced off below.
    x_pad = jnp.zeros((Hp, Wp), jnp.float32).at[:H, :W].set(x)
    phases = (
        x_pad.reshape(PH, s, PW, s)
        .transpose(1, 3, 0, 2)
        .reshape(s * s, PH, PW)
    )

    kernel = functools.partial(_conv2d_kernel, kh=KH, kw=KW, stride=s)
    cost = pl.CostEstimate(
        flops=2 * KH * KW * OH * OW,
        transcendentals=0,
        bytes_accessed=4 * (H * W + KH * KW + 1 + OH * OW),
    )

    out_pad = pl.pallas_call(
        kernel,
        out_shape=jax.ShapeDtypeStruct((OH_pad, OW_pad), jnp.float32),
        in_specs=[
            pl.BlockSpec(memory_space=pltpu.MemorySpace.VMEM),   # stride phases
            pl.BlockSpec(memory_space=pltpu.MemorySpace.SMEM),   # weight taps (scalars)
            pl.BlockSpec(memory_space=pltpu.MemorySpace.SMEM),   # bias (scalar)
        ],
        out_specs=pl.BlockSpec(memory_space=pltpu.MemorySpace.VMEM),
        cost_estimate=cost,
    )(phases, weight, bias)

    return out_pad[:OH, :OW]


def _reference(x, weight, bias, stride):
    """Pure-JAX port of the PyTorch corr2d loop, for correctness checking."""
    KH, KW = weight.shape
    OH = (x.shape[0] - KH) // stride + 1
    OW = (x.shape[1] - KW) // stride + 1
    out = jnp.zeros((OH, OW), jnp.float32)
    for i in range(OH):
        for j in range(OW):
            win = x[i * stride:i * stride + KH, j * stride:j * stride + KW]
            out = out.at[i, j].set(jnp.sum(win * weight))
    return out + bias[0]


if __name__ == "__main__":
    key = jax.random.PRNGKey(0)
    kx, kw, kb = jax.random.split(key, 3)

    # Small shapes consistent with the module: a single 16x16 image,
    # kernel_size=(3, 3), stride=2.
    H, W = 16, 16
    kernel_size = (3, 3)
    stride = 2

    x = jax.random.normal(kx, (H, W), dtype=jnp.float32)
    weight = jax.random.normal(kw, kernel_size, dtype=jnp.float32)   # nn.Parameter(torch.randn(kernel_size))
    bias = jax.random.normal(kb, (1,), dtype=jnp.float32)            # nn.Parameter(torch.randn(1))

    out = conv2d(x, weight, bias, stride)
    out = jax.block_until_ready(out)

    ref = _reference(x, weight, bias, stride)
    assert out.shape == ref.shape, (out.shape, ref.shape)
    assert jnp.allclose(out, ref, atol=1e-5, rtol=1e-5), "mismatch vs reference"

    print("KERNEL_OK")
</pallas_src>

<mosaic_0001>
module attributes {stable_mosaic.version = 11 : i64} {
  func.func @_conv2d_kernel(%arg0: memref<4x16x256xf32, #tpu.memory_space<vmem>>, %arg1: memref<3x3xf32, #tpu.memory_space<smem>>, %arg2: memref<1xf32, #tpu.memory_space<smem>>, %arg3: memref<8x128xf32, #tpu.memory_space<vmem>>) attributes {dimension_semantics = [], scalar_prefetch = 0 : i64, scratch_operands = 0 : i64, tpu.core_type = #tpu.core_type<tc>} {
    %c0 = arith.constant 0 : index
    %0 = memref.load %arg2[%c0] : memref<1xf32, #tpu.memory_space<smem>>
    %1 = vector.broadcast %0 : f32 to vector<8x128xf32>
    %c0_0 = arith.constant 0 : index
    %c0_1 = arith.constant 0 : index
    %c0_2 = arith.constant 0 : index
    %2 = vector.load %arg0[%c0_0, %c0_1, %c0_2] : memref<4x16x256xf32, #tpu.memory_space<vmem>>, vector<1x8x128xf32>
    %3 = vector.shape_cast %2 : vector<1x8x128xf32> to vector<8x128xf32>
    %c0_3 = arith.constant 0 : index
    %c0_4 = arith.constant 0 : index
    %4 = memref.load %arg1[%c0_3, %c0_4] : memref<3x3xf32, #tpu.memory_space<smem>>
    %5 = vector.broadcast %4 : f32 to vector<8x128xf32>
    %6 = arith.mulf %3, %5 : vector<8x128xf32>
    %7 = arith.addf %1, %6 : vector<8x128xf32>
    %c1 = arith.constant 1 : index
    %c0_5 = arith.constant 0 : index
    %c0_6 = arith.constant 0 : index
    %8 = vector.load %arg0[%c1, %c0_5, %c0_6] : memref<4x16x256xf32, #tpu.memory_space<vmem>>, vector<1x8x128xf32>
    %9 = vector.shape_cast %8 : vector<1x8x128xf32> to vector<8x128xf32>
    %c0_7 = arith.constant 0 : index
    %c1_8 = arith.constant 1 : index
    %10 = memref.load %arg1[%c0_7, %c1_8] : memref<3x3xf32, #tpu.memory_space<smem>>
    %11 = vector.broadcast %10 : f32 to vector<8x128xf32>
    %12 = arith.mulf %9, %11 : vector<8x128xf32>
    %13 = arith.addf %7, %12 : vector<8x128xf32>
    %c0_9 = arith.constant 0 : index
    %c0_10 = arith.constant 0 : index
    %c1_11 = arith.constant 1 : index
    %14 = vector.load %arg0[%c0_9, %c0_10, %c1_11] : memref<4x16x256xf32, #tpu.memory_space<vmem>>, vector<1x8x128xf32>
    %15 = vector.shape_cast %14 : vector<1x8x128xf32> to vector<8x128xf32>
    %c0_12 = arith.constant 0 : index
    %c2 = arith.constant 2 : index
    %16 = memref.load %arg1[%c0_12, %c2] : memref<3x3xf32, #tpu.memory_space<smem>>
    %17 = vector.broadcast %16 : f32 to vector<8x128xf32>
    %18 = arith.mulf %15, %17 : vector<8x128xf32>
    %19 = arith.addf %13, %18 : vector<8x128xf32>
    %c2_13 = arith.constant 2 : index
    %c0_14 = arith.constant 0 : index
    %c0_15 = arith.constant 0 : index
    %20 = vector.load %arg0[%c2_13, %c0_14, %c0_15] : memref<4x16x256xf32, #tpu.memory_space<vmem>>, vector<1x8x128xf32>
    %21 = vector.shape_cast %20 : vector<1x8x128xf32> to vector<8x128xf32>
    %c1_16 = arith.constant 1 : index
    %c0_17 = arith.constant 0 : index
    %22 = memref.load %arg1[%c1_16, %c0_17] : memref<3x3xf32, #tpu.memory_space<smem>>
    %23 = vector.broadcast %22 : f32 to vector<8x128xf32>
    %24 = arith.mulf %21, %23 : vector<8x128xf32>
    %25 = arith.addf %19, %24 : vector<8x128xf32>
    %c3 = arith.constant 3 : index
    %c0_18 = arith.constant 0 : index
    %c0_19 = arith.constant 0 : index
    %26 = vector.load %arg0[%c3, %c0_18, %c0_19] : memref<4x16x256xf32, #tpu.memory_space<vmem>>, vector<1x8x128xf32>
    %27 = vector.shape_cast %26 : vector<1x8x128xf32> to vector<8x128xf32>
    %c1_20 = arith.constant 1 : index
    %c1_21 = arith.constant 1 : index
    %28 = memref.load %arg1[%c1_20, %c1_21] : memref<3x3xf32, #tpu.memory_space<smem>>
    %29 = vector.broadcast %28 : f32 to vector<8x128xf32>
    %30 = arith.mulf %27, %29 : vector<8x128xf32>
    %31 = arith.addf %25, %30 : vector<8x128xf32>
    %c2_22 = arith.constant 2 : index
    %c0_23 = arith.constant 0 : index
    %c1_24 = arith.constant 1 : index
    %32 = vector.load %arg0[%c2_22, %c0_23, %c1_24] : memref<4x16x256xf32, #tpu.memory_space<vmem>>, vector<1x8x128xf32>
    %33 = vector.shape_cast %32 : vector<1x8x128xf32> to vector<8x128xf32>
    %c1_25 = arith.constant 1 : index
    %c2_26 = arith.constant 2 : index
    %34 = memref.load %arg1[%c1_25, %c2_26] : memref<3x3xf32, #tpu.memory_space<smem>>
    %35 = vector.broadcast %34 : f32 to vector<8x128xf32>
    %36 = arith.mulf %33, %35 : vector<8x128xf32>
    %37 = arith.addf %31, %36 : vector<8x128xf32>
    %c0_27 = arith.constant 0 : index
    %c1_28 = arith.constant 1 : index
    %c0_29 = arith.constant 0 : index
    %38 = vector.load %arg0[%c0_27, %c1_28, %c0_29] : memref<4x16x256xf32, #tpu.memory_space<vmem>>, vector<1x8x128xf32>
    %39 = vector.shape_cast %38 : vector<1x8x128xf32> to vector<8x128xf32>
    %c2_30 = arith.constant 2 : index
    %c0_31 = arith.constant 0 : index
    %40 = memref.load %arg1[%c2_30, %c0_31] : memref<3x3xf32, #tpu.memory_space<smem>>
    %41 = vector.broadcast %40 : f32 to vector<8x128xf32>
    %42 = arith.mulf %39, %41 : vector<8x128xf32>
    %43 = arith.addf %37, %42 : vector<8x128xf32>
    %c1_32 = arith.constant 1 : index
    %c1_33 = arith.constant 1 : index
    %c0_34 = arith.constant 0 : index
    %44 = vector.load %arg0[%c1_32, %c1_33, %c0_34] : memref<4x16x256xf32, #tpu.memory_space<vmem>>, vector<1x8x128xf32>
    %45 = vector.shape_cast %44 : vector<1x8x128xf32> to vector<8x128xf32>
    %c2_35 = arith.constant 2 : index
    %c1_36 = arith.constant 1 : index
    %46 = memref.load %arg1[%c2_35, %c1_36] : memref<3x3xf32, #tpu.memory_space<smem>>
    %47 = vector.broadcast %46 : f32 to vector<8x128xf32>
    %48 = arith.mulf %45, %47 : vector<8x128xf32>
    %49 = arith.addf %43, %48 : vector<8x128xf32>
    %c0_37 = arith.constant 0 : index
    %c1_38 = arith.constant 1 : index
    %c1_39 = arith.constant 1 : index
    %50 = vector.load %arg0[%c0_37, %c1_38, %c1_39] : memref<4x16x256xf32, #tpu.memory_space<vmem>>, vector<1x8x128xf32>
    %51 = vector.shape_cast %50 : vector<1x8x128xf32> to vector<8x128xf32>
    %c2_40 = arith.constant 2 : index
    %c2_41 = arith.constant 2 : index
    %52 = memref.load %arg1[%c2_40, %c2_41] : memref<3x3xf32, #tpu.memory_space<smem>>
    %53 = vector.broadcast %52 : f32 to vector<8x128xf32>
    %54 = arith.mulf %51, %53 : vector<8x128xf32>
    %55 = arith.addf %49, %54 : vector<8x128xf32>
    %c0_42 = arith.constant 0 : index
    %c0_43 = arith.constant 0 : index
    %56 = vector.load %arg3[%c0_42, %c0_43] : memref<8x128xf32, #tpu.memory_space<vmem>>, vector<8x128xf32>
    tpu.vector_store %arg3[%c0_42, %c0_43], %55 {strides = array<i32>} : memref<8x128xf32, #tpu.memory_space<vmem>>, vector<8x128xf32>,
    return
  }
}

</mosaic_0001>

<bundles_post_ra>
// kernel: tpu_custom_call.1
= control target key start
LH: loop header
LB: loop body
LE: loop exit
PB: predicated region body
PF: predicated region fallthrough
CT: control target
= control target key end

     0   :  { %9 = vsyncpa [#allocation4], 0  ;;  %s309_s0 = inlined_call_operand.hbm [shape: f32[4,16,256], index: 0, kind: input, shape index: {}]   ;;  %s310_s1 = inlined_call_operand.vmem [shape: f32[3,3], index: 1, kind: input, shape index: {}]   ;;  %s311_s2 = inlined_call_operand.<no memory space> [shape: f32[1], index: 2, kind: input, shape index: {}]   ;;  %s312_s3 = inlined_call_operand.hbm [shape: f32[8,128], index: 3, kind: output, shape index: {}]  }
   0x1   :  { %10 = vsyncpa [#allocation6], 0 }
   0x2   :  { %11 = vsyncpa [#allocation5], 0  ;;  %s246_s12 = smov [#allocation3]   ;;  %s30_s16 = sshll.u32 %s310_s1, 4  ;;  %s31_s16 = int_to_ptr.vmem [resolvable:$true] %s30_s16 }
   0x3   :  { %s17_s13 = sshll.u32 %s246_s12, 4  ;;  %s184_s19 = scalar_lea.hbm %s309_s0, 2048  ;;  %s18_s13 = int_to_ptr.vmem [resolvable:$true] %s17_s13 }
   0x4   :  { %p185_p0 = scmp.ne.s32.totalorder %s309_s0, %s184_s19  ;;  %p188_p1 = scmp.lt.u32.totalorder %s184_s19, %s309_s0 }
   0x6   :  { %p190_p2 = pnand %p188_p1, %p185_p0 }
   0x8   :  { %193 = shalt.err (!%p190_p2)
}
   0x9   :  { %s194_s24 = scalar_lea.vmem %s18_s13, 2048  ;;  %p199_p4 = scmp.lt.s32.totalorder %s18_s13, %s18_s13 }
   0xa   :  { %p195_p3 = scmp.ne.s32.totalorder %s18_s13, %s194_s24  ;;  %p200_p5 = scmp.lt.s32.totalorder %s194_s24, %s194_s24 }
   0xc   :  { %p201_p6 = por %p200_p5, %p199_p4 }
   0xe   :  { %p202_p7 = pnand %p201_p6, %p195_p3 }
  0x10   :  { %205 = shalt.err (!%p202_p7)
}
  0x11   :  { %s247_s1 = smov 256   ;;  %s248_s25 = smov 16  }
  0x12   :  { %23 = dma.hbm_to_vmem [thread:$0]  %s309_s0, 2048, %s18_s13, [#allocation4], %s247_s1, %s247_s1, %s248_s25  }
  0x13   :  { %s206_s28 = scalar_lea.vmem %s31_s16, 64  ;;  %p211_p9 = scmp.lt.s32.totalorder %s31_s16, %s31_s16 }
  0x14   :  { %p207_p8 = scmp.ne.s32.totalorder %s31_s16, %s206_s28  ;;  %p212_p10 = scmp.lt.s32.totalorder %s206_s28, %s206_s28 }
  0x16   :  { %p213_p11 = por %p212_p10, %p211_p9 }
  0x18   :  { %p214_p12 = pnand %p213_p11, %p207_p8 }
  0x1a   :  { %217 = shalt.err (!%p214_p12)
}
  0x1b   :  { %s249_s29 = smov [#allocation7]  }
  0x1c   :  { %33 = dma.vmem_to_smem %s31_s16, 64, %s249_s29, [#allocation6]  }
  0x1d   :  { %240 = dma.done.wait [#allocation4], 2048  }
  0x1e   :  { %241 = vsyncadd [#allocation4], 4294965248 }
  0x1f   :  { %242 = dma.done.wait [#allocation6], 64  }
  0x20   :  { %243 = vsyncadd [#allocation6], 4294967232 }
  0x21   :  { %42 = sfence }
  0x22   :  { %s171_s30 = sld [smem:[#allocation7 + $0x2]]  ;;  %v56_v0 = vld [vmem:[#allocation3] sm:$0xff]  ;;  %v57_v1 = vld [vmem:[#allocation3 + $0x8] sm:$0xff]  ;;  %v129_v5 = vld [vmem:[#allocation3 + $0x18] sm:$0x1]  ;;  %s250_s0 = smov 127   ;;  %v44_v27 = vstv %s311_s2 }
  0x23   :  { %s174_s4 = sld [smem:[#allocation7 + $0x82]]  ;;  %v84_v2 = vld [vmem:[#allocation3 + $0x40] sm:$0xff]  ;;  %v127_v3 = vld [vmem:[#allocation3 + $0x8] sm:$0xfe]  ;;  %v128_v7 = vld [vmem:[#allocation3 + $0x10] sm:$0x1] }
  0x24   :  { %s177_s5 = sld [smem:[#allocation7 + $0x102]]  ;;  %v126_v6 = vld [vmem:[#allocation3] sm:$0xfe]  ;;  %v85_v9 = vld [vmem:[#allocation3 + $0x48] sm:$0xff]  ;;  %vm107_vm0 = vcmask 1046528   ;;  %s46_s6 = sld [smem:[#allocation7]] }
  0x25   :  { %s170_s7 = sld [smem:[#allocation7 + $0x1]]  ;;  %s175_s8 = sld [smem:[#allocation7 + $0x100]]  ;;  %v51_v28 = vld [vmem:[#allocation3 + $0x20] sm:$0xff]  ;;  %v100_v34 = vld [vmem:[#allocation3 + $0x10] sm:$0x1]  ;;  %vm68_vm1 = vcmask 1039360  }
  0x26   :  { %s172_s9 = sld [smem:[#allocation7 + $0x80]]  ;;  %s176_s10 = sld [smem:[#allocation7 + $0x101]]  ;;  %v99_v33 = vld [vmem:[#allocation3] sm:$0xfe]  ;;  %v114_v40 = vld [vmem:[#allocation3 + $0x30] sm:$0x1] }
  0x27   :  { %s173_s13 = sld [smem:[#allocation7 + $0x81]]  ;;  %v113_v39 = vld [vmem:[#allocation3 + $0x20] sm:$0xfe]  ;;  %s251_s2 = smov [#allocation8]  }
  0x28   :  { %v59_v4 = vstv %s171_s30  ;;  %v79_v42 = vld [vmem:[#allocation3 + $0x60] sm:$0xff]  ;;  %s160_s14 = sshll.u32 %s251_s2, 4  ;;  %s161_s14 = int_to_ptr.vmem [resolvable:$true] %s160_s14 }
  0x29   :  { %v60_v8 = vmul.f32 %v59_v4, %v56_v0  ;;  %v87_v10 = vstv %s174_s4  ;;  %v61_v11 = vmul.f32 %v59_v4, %v57_v1  ;;  %s218_s15 = scalar_lea.vmem %s161_s14, 128  ;;  %p223_p0 = scmp.lt.s32.totalorder %s161_s14, %s161_s14 }
  0x2a   :  { %v88_v12 = vmul.f32 %v87_v10, %v84_v2  ;;  %v131_v13 = vstv %s177_s5  ;;  %v89_v18 = vmul.f32 %v87_v10, %v85_v9  ;;  %v47_v25 = vstv %s46_s6  ;;  %p219_p13 = scmp.ne.s32.totalorder %s161_s14, %s218_s15  ;;  %p224_p1 = scmp.lt.s32.totalorder %s218_s15, %s218_s15 }
  0x2b   :  { %64 = vrot.lane.b32.xlu0 %v60_v8, %s250_s0  ;;  %v133_v14 = vmul.f32 %v131_v13, %v127_v3  ;;  %v135_v15 = vmul.f32 %v131_v13, %v129_v5  ;;  %v132_v16 = vmul.f32 %v131_v13, %v126_v6  ;;  %v134_v17 = vmul.f32 %v131_v13, %v128_v7 }
  0x2c   :  { %92 = vrot.lane.b32.xlu1 %v88_v12, %s250_s0  ;;  %v48_v26 = vmul.f32 %v56_v0, %v47_v25  ;;  %v53_v29 = vstv %s170_s7  ;;  %v102_v35 = vstv %s175_s8  ;;  %v75_v36 = vstv %s172_s9  ;;  %p225_p2 = por %p224_p1, %p223_p0 }
  0x2d   :  { %v143_v19 = vrot.slane %v133_v14, 1  ;;  %v144_v20 = vrot.slane %v135_v15, 1  ;;  %v140_v21 = vrot.slane %v132_v16, 1  ;;  %v141_v22 = vrot.slane %v134_v17, 1 }
  0x2e   :  { %v49_v30 = vadd.f32 %v48_v26, %v44_v27  ;;  %v54_v31 = vmul.f32 %v53_v29, %v51_v28  ;;  %v116_v41 = vstv %s176_s10  ;;  %v81_v43 = vstv %s173_s13  ;;  %p226_p3 = pnand %p225_p2, %p219_p13 }
  0x2f   :  { %66 = vrot.lane.b32.xlu0 %v61_v11, %s250_s0  ;;  %v142_v23 = vsel %vm107_vm0, %v140_v21, %v141_v22  ;;  %v145_v24 = vsel %vm107_vm0, %v143_v19, %v144_v20  ;;  %v103_v44 = vmul.f32 %v102_v35, %v99_v33  ;;  %v104_v45 = vmul.f32 %v102_v35, %v100_v34 }
  0x30   :  { %94 = vrot.lane.b32.xlu1 %v89_v18, %s250_s0  ;;  %v55_v38 = vadd.f32 %v54_v31, %v49_v30  ;;  %v76_v46 = vmul.f32 %v84_v2, %v75_v36  ;;  %v117_v49 = vmul.f32 %v116_v41, %v113_v39  ;;  %v118_v50 = vmul.f32 %v116_v41, %v114_v40 }
  0x31   :  { %v82_v52 = vmul.f32 %v81_v43, %v79_v42  ;;  %v108_v53 = vrot.slane %v103_v44, 1  ;;  %v109_v54 = vrot.slane %v104_v45, 1 }
  0x32   :  { %v121_v57 = vrot.slane %v117_v49, 1  ;;  %v122_v58 = vrot.slane %v118_v50, 1 }
  0x33   :  { %146 = vrot.lane.b32.xlu0 %v142_v23, %s250_s0  ;;  %v110_v60 = vsel %vm107_vm0, %v108_v53, %v109_v54 }
  0x34   :  { %148 = vrot.lane.b32.xlu1 %v145_v24, %s250_s0  ;;  %v123_v1 = vsel %vm107_vm0, %v121_v57, %v122_v58 }
  0x9d   :  { %v65_v32 = vpop.permute.xlu0 %64 }
  0x9e   :  { %v93_v37 = vpop.permute.xlu1 %92 }
  0xa1   :  { %v67_v47 = vpop.permute.xlu0 %66 }
  0xa2   :  { %v69_v48 = vsel %vm68_vm1, %v65_v32, %v67_v47  ;;  %v95_v56 = vpop.permute.xlu1 %94 }
  0xa3   :  { %v71_v51 = vadd.f32 %v69_v48, %v55_v38  ;;  %v96_v61 = vsel %vm68_vm1, %v93_v37, %v95_v56 }
  0xa5   :  { %v77_v55 = vadd.f32 %v76_v46, %v71_v51  ;;  %v147_v0 = vpop.permute.xlu0 %146 }
  0xa6   :  { %v149_v63 = vpop.permute.xlu1 %148 }
  0xa7   :  { %v83_v59 = vadd.f32 %v82_v52, %v77_v55  ;;  %v150_v3 = vsel %vm68_vm1, %v147_v0, %v149_v63 }
  0xa9   :  { %v98_v62 = vadd.f32 %v96_v61, %v83_v59 }
  0xab   :  { %v112_v2 = vadd.f32 %v110_v60, %v98_v62 }
  0xad   :  { %v125_v4 = vadd.f32 %v123_v1, %v112_v2 }
  0xaf   :  { %v152_v5 = vadd.f32 %v150_v3, %v125_v4 }
  0xb1   :  { %153 = vst [vmem:[#allocation8] sm:$0xff] %v152_v5 }
  0xb2   :  { %229 = shalt.err (!%p226_p3)
}
  0xb3   :  { %s230_s18 = scalar_lea.hbm %s312_s3, 128 }
  0xb4   :  { %p231_p4 = scmp.ne.s32.totalorder %s312_s3, %s230_s18  ;;  %p234_p5 = scmp.lt.u32.totalorder %s230_s18, %s312_s3 }
  0xb6   :  { %p236_p6 = pnand %p234_p5, %p231_p4 }
  0xb8   :  { %239 = shalt.err (!%p236_p6)
}
  0xb9   :  { %163 = dma.vmem_to_hbm [thread:$0]  %s161_s14, 128, %s312_s3, [#allocation5]  }
  0xba   :  { %244 = dma.done.wait [#allocation5], 128  }
  0xbb   :  { %245 = vsyncadd [#allocation5], 4294967168 }
  0xbc   :  { %167 = vsyncpa [#allocation4], 1 }
  0xbd   :  { %168 = vsyncpa [#allocation5], 1 }
  0xbe   :  { %169 = vsyncpa [#allocation6], 1 }

</bundles_post_ra>
